<compile_context>
chip_gen: v6e
topology: v6e:2x2x1
jax: 0.10.0
libtpu: 0.0.40
codegen_flags: <defaults>
</compile_context>

<pallas_src>
import functools

import jax
import jax.numpy as jnp
from jax.experimental import pallas as pl
from jax.experimental.pallas import tpu as pltpu


def _round_up(x, m):
    return (x + m - 1) // m * m


def _cdiv(a, b):
    return (a + b - 1) // b


# ----------------------------- Pallas kernels -------------------------------
def _matmul_bias_kernel_fullk(p_ref, w_ref, b_ref, o_ref):
    # p_ref: (tm, K_pad) bf16, w_ref: (K_pad, tn) bf16, b_ref: (1, tn) f32.
    # Whole (padded) K contraction is resident in VMEM -> single MXU burst,
    # no accumulator scratch, no per-step init/epilogue.
    o_ref[...] = (jnp.dot(p_ref[...], w_ref[...],
                          preferred_element_type=jnp.float32)
                  + b_ref[...]).astype(o_ref.dtype)


def _matmul_bias_kernel_kloop(p_ref, w_ref, b_ref, o_ref):
    # K-tiled fallback for very large K. o_ref is resident across the k axis
    # (its index_map ignores k), so accumulate directly into it: bias written
    # once at k == 0, then += dot each step. No separate acc scratch.
    k = pl.program_id(2)

    @pl.when(k == 0)
    def _():
        o_ref[...] = jnp.broadcast_to(b_ref[...], o_ref.shape).astype(o_ref.dtype)

    o_ref[...] += jnp.dot(p_ref[...], w_ref[...],
                          preferred_element_type=jnp.float32)


def _conv_matmul(patches, w_mat, bias_row, *, tm, tn, tk):
    M, K_pad = patches.shape
    _, N_pad = w_mat.shape

    flops = 2 * M * K_pad * N_pad
    bytes_accessed = (patches.size * patches.dtype.itemsize
                      + w_mat.size * w_mat.dtype.itemsize
                      + bias_row.size * 4
                      + M * N_pad * 4)

    gm = _cdiv(M, tm)          # last M tile may be partial (masked store)
    gn = N_pad // tn

    if tk >= K_pad:
        # Collapsed-K path (default for conv-sized K).
        grid = (gm, gn)
        kernel = _matmul_bias_kernel_fullk
        in_specs = [
            pl.BlockSpec((tm, K_pad), lambda i, j: (i, 0)),
            pl.BlockSpec((K_pad, tn), lambda i, j: (0, j)),
            pl.BlockSpec((1, tn), lambda i, j: (0, j)),
        ]
        out_specs = pl.BlockSpec((tm, tn), lambda i, j: (i, j))
        dim_sem = ("parallel", "parallel")
    else:
        # Large-K fallback: reduction axis last, accumulate into o_ref.
        grid = (gm, gn, K_pad // tk)
        kernel = _matmul_bias_kernel_kloop
        in_specs = [
            pl.BlockSpec((tm, tk), lambda i, j, k: (i, k)),
            pl.BlockSpec((tk, tn), lambda i, j, k: (k, j)),
            pl.BlockSpec((1, tn), lambda i, j, k: (0, j)),
        ]
        out_specs = pl.BlockSpec((tm, tn), lambda i, j, k: (i, j))
        dim_sem = ("parallel", "parallel", "arbitrary")

    return pl.pallas_call(
        kernel,
        out_shape=jax.ShapeDtypeStruct((M, N_pad), jnp.float32),
        grid_spec=pltpu.PrefetchScalarGridSpec(
            num_scalar_prefetch=0,
            grid=grid,
            in_specs=in_specs,
            out_specs=out_specs,
        ),
        compiler_params=pltpu.CompilerParams(
            dimension_semantics=dim_sem,
            # Let XLA fuse the pad/cast producers into the input DMAs.
            allow_input_fusion=[True, True, True],
            # Worst-case footprint here is ~14 MiB; 32 MiB is safe on every
            # generation (v7x physical VMEM is 64 MiB per TC).
            vmem_limit_bytes=32 * 1024 * 1024,
        ),
        cost_estimate=pl.CostEstimate(
            flops=flops, transcendentals=0, bytes_accessed=bytes_accessed),
    )(patches, w_mat, bias_row)


# ------------------------------ Module port ---------------------------------
class Convolution:
    """JAX/Pallas port of the PyTorch custom Convolution module."""

    def __init__(self, in_channels, out_channels, kernel_size, stride=1,
                 padding=0, *, key=None):
        if key is None:
            key = jax.random.PRNGKey(0)
        kw_key, kb_key = jax.random.split(key)
        # torch.randn-equivalent deterministic init (standard normal).
        self.weights = jax.random.normal(
            kw_key, (out_channels, in_channels, kernel_size, kernel_size),
            dtype=jnp.float32)
        self.bias = jax.random.normal(kb_key, (out_channels,), dtype=jnp.float32)
        self.stride = stride
        self.padding = padding

    def __call__(self, x):
        return conv_forward(x, self.weights, self.bias, self.stride,
                            self.padding)


@functools.partial(jax.jit, static_argnums=(3, 4))
def conv_forward(x, weights, bias, stride, padding):
    # x: (B, IC, H, W) float32 (NCHW, same as PyTorch).
    B, IC, H, W = x.shape
    OC, _, KH, KW = weights.shape
    OH = (H + 2 * padding - KH) // stride + 1
    OW = (W + 2 * padding - KW) // stride + 1

    # NHWC internally (channels on the lane axis). Cast to bf16 BEFORE im2col
    # so the materialized patches matrix is half the size in HBM.
    # NOTE: bf16 MXU inputs with f32 accumulation is a deliberate precision
    # drop vs. PyTorch's full-f32 conv (bounded by the self-test tolerances).
    x_nhwc = jnp.transpose(x, (0, 2, 3, 1)).astype(jnp.bfloat16)
    if padding > 0:
        x_nhwc = jnp.pad(
            x_nhwc, ((0, 0), (padding, padding), (padding, padding), (0, 0)))

    # --- im2col glue (plain JAX): patches[(b,oh,ow), (kh,kw,ic)] ---
    slabs = []
    for kh in range(KH):
        for kw in range(KW):
            sl = x_nhwc[:,
                        kh: kh + (OH - 1) * stride + 1: stride,
                        kw: kw + (OW - 1) * stride + 1: stride,
                        :]                                  # (B, OH, OW, IC)
            slabs.append(sl)
    patches = jnp.stack(slabs, axis=3)                      # (B, OH, OW, KH*KW, IC)

    M = B * OH * OW
    K = IC * KH * KW
    patches = patches.reshape(M, K)                         # bf16

    # Weight as (K, OC) with K ordered (kh, kw, ic) to match patches.
    w_mat = jnp.transpose(weights, (2, 3, 1, 0)).reshape(K, OC).astype(jnp.bfloat16)

    # --- pad to MXU / lane-friendly shapes ---
    # K is zero-padded (needed for reduction correctness), N padded to a lane
    # multiple. M is NOT padded in HBM: the grid uses cdiv(M, tm); garbage rows
    # of a partial LHS tile only feed output rows that are sliced off below,
    # and the partial output tile's store is masked.
    N_pad = _round_up(OC, 128)
    K_pad = _round_up(K, 128)

    patches_p = jnp.pad(patches, ((0, 0), (0, K_pad - K)))
    w_p = jnp.pad(w_mat, ((0, K_pad - K), (0, N_pad - OC)))
    bias_p = jnp.pad(bias.astype(jnp.float32), (0, N_pad - OC)).reshape(1, N_pad)

    # --- tile selection (works across v5e / v6e / v7x) ---
    tn = 256 if N_pad % 256 == 0 else 128       # fill the 256x256 MXU when possible
    if M >= 512:
        tm = 512
    elif M >= 256:
        tm = 256
    elif M >= 128:
        tm = 128
    else:
        tm = _round_up(M, 16)                   # bf16 packs 16 sublanes per vreg
    # Keep >= 2 parallel grid tiles so both v7x TensorCores (and v6e megacore)
    # get work when the N axis has only a single tile.
    while (N_pad // tn) == 1 and tm > 128 and _cdiv(M, tm) < 2:
        tm //= 2

    # Collapse the K grid axis when the whole padded K fits comfortably in
    # VMEM (safe even on v7x's 64 MiB); otherwise K-tiled fallback.
    if K_pad <= 4096:
        tk = K_pad
    else:
        tk = next(t for t in (2048, 1024, 512, 256, 128) if K_pad % t == 0)

    # --- hot path: tiled matmul + bias on the MXU ---
    out_flat = _conv_matmul(patches_p, w_p, bias_p, tm=tm, tn=tn, tk=tk)

    out = out_flat[:M, :OC].reshape(B, OH, OW, OC)
    # NCHW to match the PyTorch module's forward contract.
    return jnp.transpose(out, (0, 3, 1, 2))


# --------------------------------- main --------------------------------------
if __name__ == "__main__":
    key = jax.random.PRNGKey(0)
    k_params, k_x = jax.random.split(key)

    B, IC, H, W = 2, 4, 16, 16
    OC, KSZ, STRIDE, PAD = 8, 3, 1, 1

    conv = Convolution(IC, OC, KSZ, stride=STRIDE, padding=PAD, key=k_params)
    x = jax.random.normal(k_x, (B, IC, H, W), dtype=jnp.float32)

    out = conv(x)
    out = jax.block_until_ready(out)

    OH = (H + 2 * PAD - KSZ) // STRIDE + 1
    OW = (W + 2 * PAD - KSZ) // STRIDE + 1
    assert out.shape == (B, OC, OH, OW)

    # Reference 1: identical bf16-input / f32-accumulate math via XLA conv
    # (tight check: differences are accumulation-order only).
    ref_bf16 = jax.lax.conv_general_dilated(
        x.astype(jnp.bfloat16), conv.weights.astype(jnp.bfloat16),
        window_strides=(STRIDE, STRIDE),
        padding=((PAD, PAD), (PAD, PAD)),
        dimension_numbers=("NCHW", "OIHW", "NCHW"),
        preferred_element_type=jnp.float32)
    ref_bf16 = ref_bf16 + conv.bias.reshape(1, OC, 1, 1)
    assert jnp.allclose(out, ref_bf16, atol=1e-2, rtol=1e-2)

    # Reference 2: full-f32 conv (loose check: bounds bf16 input-rounding error).
    ref_f32 = jax.lax.conv_general_dilated(
        x, conv.weights, window_strides=(STRIDE, STRIDE),
        padding=((PAD, PAD), (PAD, PAD)),
        dimension_numbers=("NCHW", "OIHW", "NCHW"))
    ref_f32 = ref_f32 + conv.bias.reshape(1, OC, 1, 1)
    assert jnp.allclose(out, ref_f32, atol=2.5e-1, rtol=5e-2)

    print("KERNEL_OK")
</pallas_src>

<mosaic_0001>
module attributes {stable_mosaic.version = 11 : i64} {
  func.func @_matmul_bias_kernel_fullk(%arg0: i32, %arg1: i32, %arg2: memref<256x128xbf16, #tpu.memory_space<vmem>>, %arg3: memref<128x128xbf16, #tpu.memory_space<vmem>>, %arg4: memref<1x128xf32, #tpu.memory_space<vmem>>, %arg5: memref<256x128xf32, #tpu.memory_space<vmem>>) attributes {dimension_semantics = [#tpu.dimension_semantics<parallel>, #tpu.dimension_semantics<parallel>], iteration_bounds = array<i64: 2, 1>, scalar_prefetch = 0 : i64, scratch_operands = 0 : i64, tpu.core_type = #tpu.core_type<tc>, window_params = [{transform_indices = @transform_0, window_bounds = array<i64: 256, 128>}, {transform_indices = @transform_1, window_bounds = array<i64: 128, 128>}, {transform_indices = @transform_2, window_bounds = array<i64: 1, 128>}, {transform_indices = @transform_3, window_bounds = array<i64: 256, 128>}]} {
    %c0 = arith.constant 0 : index
    %c0_0 = arith.constant 0 : index
    %0 = vector.load %arg2[%c0, %c0_0] : memref<256x128xbf16, #tpu.memory_space<vmem>>, vector<256x128xbf16>
    %c0_1 = arith.constant 0 : index
    %c0_2 = arith.constant 0 : index
    %1 = vector.load %arg3[%c0_1, %c0_2] : memref<128x128xbf16, #tpu.memory_space<vmem>>, vector<128x128xbf16>
    %cst = arith.constant dense<0.000000e+00> : vector<256x128xf32>
    %2 = tpu.matmul %0, %1, %cst {dimension_numbers = #tpu.dot_dimension_numbers<[1], [0], [0], [1], [0, 0, 1, 1], [], []>} : vector<256x128xbf16>, vector<128x128xbf16>, vector<256x128xf32> -> vector<256x128xf32>
    %c0_3 = arith.constant 0 : index
    %c0_4 = arith.constant 0 : index
    %3 = vector.load %arg4[%c0_3, %c0_4] : memref<1x128xf32, #tpu.memory_space<vmem>>, vector<1x128xf32>
    %4 = vector.broadcast %3 : vector<1x128xf32> to vector<256x128xf32>
    %5 = arith.addf %2, %4 : vector<256x128xf32>
    %c0_5 = arith.constant 0 : index
    %c0_6 = arith.constant 0 : index
    %6 = vector.load %arg5[%c0_5, %c0_6] : memref<256x128xf32, #tpu.memory_space<vmem>>, vector<256x128xf32>
    tpu.vector_store %arg5[%c0_5, %c0_6], %5 {strides = array<i32>} : memref<256x128xf32, #tpu.memory_space<vmem>>, vector<256x128xf32>,
    return
  }
  func.func @transform_0(%arg0: i32, %arg1: i32) -> (i32, i32) {
    %c0_i32 = arith.constant 0 : i32
    %c0_i32_0 = arith.constant 0 : i32
    return %arg0, %c0_i32 : i32, i32
  }
  func.func @transform_1(%arg0: i32, %arg1: i32) -> (i32, i32) {
    %c0_i32 = arith.constant 0 : i32
    %c0_i32_0 = arith.constant 0 : i32
    return %c0_i32, %arg1 : i32, i32
  }
  func.func @transform_2(%arg0: i32, %arg1: i32) -> (i32, i32) {
    %c0_i32 = arith.constant 0 : i32
    %c0_i32_0 = arith.constant 0 : i32
    return %c0_i32, %arg1 : i32, i32
  }
  func.func @transform_3(%arg0: i32, %arg1: i32) -> (i32, i32) {
    %c0_i32 = arith.constant 0 : i32
    return %arg0, %arg1 : i32, i32
  }
}

</mosaic_0001>

<bundles_post_ra>
// kernel: conv_forward.2
= control target key start
LH: loop header
LB: loop body
LE: loop exit
PB: predicated region body
PF: predicated region fallthrough
CT: control target
= control target key end

     0   :  { %s2007_s22 = smov 0   ;;  %s2009_s23 = smov 0   ;;  %s2304_s0 = inlined_call_operand.vmem [shape: bf16[512,36], index: 0, kind: input, shape index: {}]   ;;  %s2305_s1 = inlined_call_operand.<no memory space> [shape: bf16[], index: 1, kind: input, shape index: {}]   ;;  %s2306_s2 = inlined_call_operand.vmem [shape: bf16[36,8], index: 2, kind: input, shape index: {}]   ;;  %s2307_s3 = inlined_call_operand.vmem [shape: f32[8], index: 3, kind: input, shape index: {}]   ;;  %s2308_s4 = inlined_call_operand.<no memory space> [shape: f32[], index: 4, kind: input, shape index: {}]   ;;  %s2309_s5 = inlined_call_operand.vmem [shape: f32[512,128], index: 5, kind: output, shape index: {}]  }
   0x1   :  { %v10_v0 = vstv %s2305_s1  ;;  %v20_v1 = vstv %s2308_s4  ;;  %s2011_s24 = smov 0  }
   0x2   :  { %v2005_v2 = vunpack.i.l.bf16 %v10_v0 }
   0x3 LB: > { %s38_s1 = sadd.s32 1, %s1962_s23  ;;  %p1710_p0 = scmp.ge.s32.totalorder %s1966_s24, 1  ;;  %s1966_s24 = sphi %s2011_s24, %s26_s24   ;;  %s1962_s23 = sphi %s2009_s23, %s2311_s23   ;;  %s1958_s22 = sphi %s2007_s22, %s2310_s22  }
   0x4   : > { %p40_p1 = scmp.ge.s32.totalorder %s38_s1, 2  ;;  %p178_p2 = scmp.lt.s32.totalorder %s1966_s24, 3 }
   0x6   : > { %s2313_s1 = smov (%p40_p1, %s38_s1), 0  ;;  %p179_p3 = pnand %p1710_p0, %p178_p2 }
   0x8   : > { %182 = sbr.rel (%p179_p3) target bundleno = 281 (0x119), region = 32 }
   0xd   : > { %v1785_v3 = vpack.c.bf16 %v2005_v2, %v2005_v2  ;;  %v246_v4 = vlaneseq  ;;  %v1749_v5 = vld [vmem:[%s2306_s2 + $0x10] sm:$0xf]  ;;  %v1214_v6 = vld [vmem:[%s2307_s3] sm:$0x1]  ;;  %v1747_v7 = vld [vmem:[%s2306_s2 + $0x8] sm:$0xff]   ;;  %s1711_s8 = sshll.u32 %s1958_s22, 5 }
   0xe   : > { %v1059_v8 = vunpack.c.l.bf16 %v1747_v7  ;;  %v1098_v9 = vunpack.c.h.bf16 %v1747_v7  ;;  %v981_v10 = vld [vmem:[%s2306_s2] sm:$0xff]   ;;  %p212_p4 = scmp.lt.s32.totalorder %s1711_s8, 63  ;;  %v1136_v14 = vunpack.c.l.bf16 %v1749_v5  ;;  %v1968_v22 = vmov 0.0  }
   0xf   : > { %1806 = vst [vmem:[#allocation18 + $0x38] sm:$0xff] %v1785_v3   ;;  %1786 = vst [vmem:[#allocation18 + $0x18] sm:$0xff] %v1785_v3   ;;  %v2042_v11 = vand.u32 127, %v246_v4  ;;  %v1143_v12 = vshrl.u32 %v246_v4, 7  ;;  %vm1217_vm0 = vcmp.lt.s32.totalorder %v246_v4, 8  ;;  %v982_v13 = vunpack.c.l.bf16 %v981_v10 }
  0x10   : > { %1791 = vst [vmem:[#allocation18 + $0x20] sm:$0xff] %v1785_v3   ;;  %1796 = vst [vmem:[#allocation18 + $0x28] sm:$0xff] %v1785_v3   ;;  %v1218_v15 = vsel %vm1217_vm0, %v1214_v6, %v20_v1  ;;  %v1020_v16 = vunpack.c.h.bf16 %v981_v10  ;;  %s2315_s8 = smov (!%p212_p4, %s1711_s8), 63 }
  0x11   : > { %1801 = vst [vmem:[#allocation18 + $0x30] sm:$0xff] %v1785_v3   ;;  %vm999_vm1 = vcmp.lt.s32.totalorder %v2042_v11, 8  ;;  %v1144_v17 = vadd.s32 32, %v1143_v12  ;;  %1221 = vst [vmem:[#allocation19] sm:$0x1] %v1218_v15  ;;  %s1712_s11 = sshll.u32 %s2315_s8, 2 }
  0x12   : > { %v1077_v18 = vsel %vm999_vm1, %v1059_v8, %v2005_v2  ;;  %v1116_v19 = vsel %vm999_vm1, %v1098_v9, %v2005_v2  ;;  %v1000_v20 = vsel %vm999_vm1, %v982_v13, %v2005_v2  ;;  %v1038_v21 = vsel %vm999_vm1, %v1020_v16, %v2005_v2  ;;  %s2072_s14 = scalar_lea.vmem %s2304_s0, %s1712_s11  ;;  %s1714_s15 = sshll.u32 %s2315_s8, 3 }
  0x13   : > { %vm1145_vm2 = vcmp.lt.s32.totalorder %v1144_v17, 36  ;;  %v1079_v23 = vpack.c.bf16 %v1968_v22, %v1077_v18  ;;  %v1118_v24 = vpack.c.bf16 %v1968_v22, %v1116_v19  ;;  %v1001_v25 = vpack.c.bf16 %v1968_v22, %v1000_v20  ;;  %v243_v29 = vld [vmem:[%s2072_s14] sm:$0xff]   ;;  %v1716_v31 = vld [vmem:[%s2072_s14 + $0x8] sm:$0xff]   ;;  %v1718_v55 = vld [vmem:[%s2072_s14 + $0x10] sm:$0xff]   ;;  %s2229_s18 = scalar_lea.vmem %s2309_s5, %s1714_s15 }
  0x14   : > { %v1146_v26 = vsel %vm1145_vm2, %v1136_v14, %v2005_v2  ;;  %v1040_v27 = vpack.c.bf16 %v1968_v22, %v1038_v21  ;;  %vm249_vm3 = vcmp.lt.s32.totalorder %v2042_v11, 36  ;;  %v1730_v30 = vld [vmem:[%s2072_s14 + $0x40] sm:$0xff]   ;;  %v244_v34 = vunpack.c.l.bf16 %v243_v29  ;;  %v1732_v54 = vld [vmem:[%s2072_s14 + $0x48] sm:$0xff]   ;;  %v1734_v0 = vld [vmem:[%s2072_s14 + $0x50] sm:$0xff]  }
  0x15   : > { %v1153_v28 = vsel %vm999_vm1, %v1146_v26, %v2005_v2  ;;  %1082 = vst [vmem:[#allocation18 + $0x8] sm:$0xf] %v1079_v23  ;;  %1121 = vst [vmem:[#allocation18 + $0xc] sm:$0xf] %v1118_v24  ;;  %v266_v35 = vunpack.c.h.bf16 %v243_v29  ;;  %v611_v36 = vunpack.c.l.bf16 %v1730_v30  ;;  %v634_v38 = vunpack.c.h.bf16 %v1730_v30  ;;  %v1720_v3 = vld [vmem:[%s2072_s14 + $0x18] sm:$0xff]   ;;  %v1722_v14 = vld [vmem:[%s2072_s14 + $0x20] sm:$0xff]  }
  0x16   : > { %1004 = vst [vmem:[#allocation18] sm:$0xf] %v1001_v25  ;;  %v1920_v32 = vld [vmem:[#allocation18 + $0x38] sm:$0xff]   ;;  %v1780_v33 = vpack.c.bf16 %v2005_v2, %v1153_v28  ;;  %1043 = vst [vmem:[#allocation18 + $0x4] sm:$0xf] %v1040_v27  ;;  %v289_v39 = vunpack.c.l.bf16 %v1716_v31  ;;  %v312_v40 = vunpack.c.h.bf16 %v1716_v31  ;;  %v250_v41 = vsel %vm249_vm3, %v244_v34, %v2005_v2  ;;  %v1738_v20 = vld [vmem:[%s2072_s14 + $0x60] sm:$0xff]  }
  0x17   : > { %1831 = vmatprep.subr.bf16.mxu0 %v1920_v32  ;;  %1879 = vmatprep.subr.bf16.mxu1 %v1920_v32  ;;  %v272_v42 = vsel %vm249_vm3, %v266_v35, %v2005_v2  ;;  %v617_v43 = vsel %vm249_vm3, %v611_v36, %v2005_v2  ;;  %v251_v44 = vpack.c.bf16 %v1968_v22, %v250_v41  ;;  %v1922_v47 = vld [vmem:[#allocation18 + $0x28] sm:$0xff]   ;;  %v657_v56 = vunpack.c.l.bf16 %v1732_v54  ;;  %v1923_v60 = vld [vmem:[#allocation18 + $0x20] sm:$0xff]   ;;  %v1736_v4 = vld [vmem:[%s2072_s14 + $0x58] sm:$0xff]  }
  0x18   : > { %v1921_v37 = vld [vmem:[#allocation18 + $0x30] sm:$0xff]   ;;  %1781 = vst [vmem:[#allocation18 + $0x10] sm:$0xff] %v1780_v33   ;;  %1832 = vmatpush3.bf16.msra.mxu0 %v1920_v32  ;;  %1887 = vmatpush3.bf16.msra.mxu1 %v1920_v32  ;;  %v274_v45 = vpack.c.bf16 %v1968_v22, %v272_v42  ;;  %v619_v46 = vpack.c.bf16 %v1968_v22, %v617_v43  ;;  %v680_v57 = vunpack.c.h.bf16 %v1732_v54  ;;  %v335_v58 = vunpack.c.l.bf16 %v1718_v55  ;;  %v1924_v15 = vld [vmem:[#allocation18 + $0x18] sm:$0xff]   ;;  %v1724_v31 = vld [vmem:[%s2072_s14 + $0x28] sm:$0xff]  }
  0x19   : > { %1833 = vmatprep.subr.bf16.mxu0 %v1921_v37  ;;  %1880 = vmatprep.subr.bf16.mxu1 %v1921_v37  ;;  %v640_v48 = vsel %vm249_vm3, %v634_v38, %v2005_v2  ;;  %v295_v49 = vsel %vm249_vm3, %v289_v39, %v2005_v2  ;;  %v318_v50 = vsel %vm249_vm3, %v312_v40, %v2005_v2  ;;  %v358_v59 = vunpack.c.h.bf16 %v1718_v55  ;;  %v1740_v32 = vld [vmem:[%s2072_s14 + $0x68] sm:$0xff]  }
  0x1a   : > { %254 = vst [vmem:[#allocation17] sm:$0xf] %v251_v44  ;;  %277 = vst [vmem:[#allocation17 + $0x4] sm:$0xf] %v274_v45  ;;  %v642_v51 = vpack.c.bf16 %v1968_v22, %v640_v48  ;;  %v297_v52 = vpack.c.bf16 %v1968_v22, %v295_v49  ;;  %v320_v53 = vpack.c.bf16 %v1968_v22, %v318_v50  ;;  %v703_v10 = vunpack.c.l.bf16 %v1734_v0 }
  0x1b   : > { %622 = vst [vmem:[#allocation17 + $0x40] sm:$0xf] %v619_v46  ;;  %v663_v61 = vsel %vm249_vm3, %v657_v56, %v2005_v2  ;;  %v686_v62 = vsel %vm249_vm3, %v680_v57, %v2005_v2  ;;  %v341_v63 = vsel %vm249_vm3, %v335_v58, %v2005_v2  ;;  %v364_v8 = vsel %vm249_vm3, %v358_v59, %v2005_v2 }
  0x1c   : > { %1834 = vmatpush3.bf16.msra.mxu0 %v1921_v37  ;;  %1888 = vmatpush3.bf16.msra.mxu1 %v1921_v37  ;;  %645 = vst [vmem:[#allocation17 + $0x44] sm:$0xf] %v642_v51  ;;  %300 = vst [vmem:[#allocation17 + $0x8] sm:$0xf] %v297_v52  ;;  %v665_v5 = vpack.c.bf16 %v1968_v22, %v663_v61  ;;  %v688_v6 = vpack.c.bf16 %v1968_v22, %v686_v62  ;;  %v726_v12 = vunpack.c.h.bf16 %v1734_v0  ;;  %v1742_v52 = vld [vmem:[%s2072_s14 + $0x70] sm:$0xff]   ;;  %v1728_v61 = vld [vmem:[%s2072_s14 + $0x38] sm:$0xff]  }
  0x1d   : > { %323 = vst [vmem:[#allocation17 + $0xc] sm:$0xf] %v320_v53  ;;  %1835 = vmatprep.subr.bf16.mxu0 %v1922_v47  ;;  %1881 = vmatprep.subr.bf16.mxu1 %v1922_v47  ;;  %v343_v7 = vpack.c.bf16 %v1968_v22, %v341_v63  ;;  %v366_v9 = vpack.c.bf16 %v1968_v22, %v364_v8  ;;  %v381_v13 = vunpack.c.l.bf16 %v1720_v3  ;;  %v404_v16 = vunpack.c.h.bf16 %v1720_v3  ;;  %v1926_v62 = vld [vmem:[#allocation18 + $0x8] sm:$0xff]  }
  0x1e   : > { %668 = vst [vmem:[#allocation17 + $0x48] sm:$0xf] %v665_v5  ;;  %691 = vst [vmem:[#allocation17 + $0x4c] sm:$0xf] %v688_v6  ;;  %v749_v17 = vunpack.c.l.bf16 %v1736_v4  ;;  %v772_v18 = vunpack.c.h.bf16 %v1736_v4  ;;  %v427_v19 = vunpack.c.l.bf16 %v1722_v14  ;;  %v709_v23 = vsel %vm249_vm3, %v703_v10, %v2005_v2 }
  0x1f   : > { %346 = vst [vmem:[#allocation17 + $0x10] sm:$0xf] %v343_v7  ;;  %369 = vst [vmem:[#allocation17 + $0x14] sm:$0xf] %v366_v9  ;;  %v732_v24 = vsel %vm249_vm3, %v726_v12, %v2005_v2  ;;  %v387_v25 = vsel %vm249_vm3, %v381_v13, %v2005_v2  ;;  %v450_v26 = vunpack.c.h.bf16 %v1722_v14  ;;  %v711_v27 = vpack.c.bf16 %v1968_v22, %v709_v23  ;;  %v1925_v42 = vld [vmem:[#allocation18 + $0x10] sm:$0xff]   ;;  %v1744_v9 = vld [vmem:[%s2072_s14 + $0x78] sm:$0xff]  }
  0x20   : > { %1836 = vmatpush3.bf16.msra.mxu0 %v1922_v47  ;;  %1889 = vmatpush3.bf16.msra.mxu1 %v1922_v47  ;;  %v734_v28 = vpack.c.bf16 %v1968_v22, %v732_v24  ;;  %v389_v29 = vpack.c.bf16 %v1968_v22, %v387_v25  ;;  %v410_v30 = vsel %vm249_vm3, %v404_v16, %v2005_v2  ;;  %v795_v41 = vunpack.c.l.bf16 %v1738_v20  ;;  %v1726_v47 = vld [vmem:[%s2072_s14 + $0x30] sm:$0xff]  }
  0x21   : > { %1837 = vmatprep.subr.bf16.mxu0 %v1923_v60  ;;  %1882 = vmatprep.subr.bf16.mxu1 %v1923_v60  ;;  %v1928_v21 = vld [vmem:[#allocation17] sm:$0xff]   ;;  %v412_v34 = vpack.c.bf16 %v1968_v22, %v410_v30  ;;  %v755_v35 = vsel %vm249_vm3, %v749_v17, %v2005_v2  ;;  %v778_v36 = vsel %vm249_vm3, %v772_v18, %v2005_v2  ;;  %v818_v44 = vunpack.c.h.bf16 %v1738_v20 }
  0x22   : > { %1847 = vmatprep.mubr.bf16.mxu0 %v1928_v21  ;;  %v433_v37 = vsel %vm249_vm3, %v427_v19, %v2005_v2  ;;  %714 = vst [vmem:[#allocation17 + $0x50] sm:$0xf] %v711_v27  ;;  %737 = vst [vmem:[#allocation17 + $0x54] sm:$0xf] %v734_v28  ;;  %v757_v38 = vpack.c.bf16 %v1968_v22, %v755_v35  ;;  %v780_v39 = vpack.c.bf16 %v1968_v22, %v778_v36  ;;  %v1927_v19 = vld [vmem:[#allocation18] sm:$0xff]  }
  0x23   : > { %v1929_v33 = vld [vmem:[#allocation17 + $0x40] sm:$0xff]   ;;  %392 = vst [vmem:[#allocation17 + $0x18] sm:$0xf] %v389_v29  ;;  %v435_v40 = vpack.c.bf16 %v1968_v22, %v433_v37  ;;  %415 = vst [vmem:[#allocation17 + $0x1c] sm:$0xf] %v412_v34  ;;  %v456_v43 = vsel %vm249_vm3, %v450_v26, %v2005_v2  ;;  %v473_v45 = vunpack.c.l.bf16 %v1724_v31  ;;  %v496_v46 = vunpack.c.h.bf16 %v1724_v31 }
  0x24   : > { %1838 = vmatpush3.bf16.msra.mxu0 %v1923_v60  ;;  %1890 = vmatpush3.bf16.msra.mxu1 %v1923_v60  ;;  %760 = vst [vmem:[#allocation17 + $0x58] sm:$0xf] %v757_v38  ;;  %783 = vst [vmem:[#allocation17 + $0x5c] sm:$0xf] %v780_v39  ;;  %v458_v48 = vpack.c.bf16 %v1968_v22, %v456_v43  ;;  %v801_v49 = vsel %vm249_vm3, %v795_v41, %v2005_v2  ;;  %v841_v50 = vunpack.c.l.bf16 %v1740_v32 }
  0x25   : > { %1839 = vmatprep.subr.bf16.mxu0 %v1924_v15  ;;  %1883 = vmatprep.subr.bf16.mxu1 %v1924_v15  ;;  %438 = vst [vmem:[#allocation17 + $0x20] sm:$0xf] %v435_v40  ;;  %v864_v51 = vunpack.c.h.bf16 %v1740_v32  ;;  %v803_v53 = vpack.c.bf16 %v1968_v22, %v801_v49  ;;  %v824_v54 = vsel %vm249_vm3, %v818_v44, %v2005_v2  ;;  %v519_v60 = vunpack.c.l.bf16 %v1726_v47  ;;  %v1930_v32 = vld [vmem:[#allocation17 + $0x8] sm:$0xff]   ;;  %v2224_v44 = vld [vmem:[#allocation19] ss:$0 sm:$0xff] }
  0x26   : > { %1863 = vmatprep.mubr.bf16.mxu1 %v1929_v33  ;;  %v479_v55 = vsel %vm249_vm3, %v473_v45, %v2005_v2  ;;  %v502_v56 = vsel %vm249_vm3, %v496_v46, %v2005_v2  ;;  %461 = vst [vmem:[#allocation17 + $0x24] sm:$0xf] %v458_v48  ;;  %v826_v57 = vpack.c.bf16 %v1968_v22, %v824_v54  ;;  %v542_v3 = vunpack.c.h.bf16 %v1726_v47  ;;  %v1931_v33 = vld [vmem:[#allocation17 + $0x48] sm:$0xff]   ;;  %v1932_v34 = vld [vmem:[#allocation17 + $0x10] sm:$0xff]  }
  0x27   : > { %v481_v58 = vpack.c.bf16 %v1968_v22, %v479_v55  ;;  %v504_v59 = vpack.c.bf16 %v1968_v22, %v502_v56  ;;  %806 = vst [vmem:[#allocation17 + $0x60] sm:$0xf] %v803_v53  ;;  %v847_v63 = vsel %vm249_vm3, %v841_v50, %v2005_v2  ;;  %v870_v0 = vsel %vm249_vm3, %v864_v51, %v2005_v2 }
  0x28   : > { %1840 = vmatpush3.bf16.msra.mxu0 %v1924_v15  ;;  %1891 = vmatpush3.bf16.msra.mxu1 %v1924_v15  ;;  %v887_v4 = vunpack.c.l.bf16 %v1742_v52  ;;  %829 = vst [vmem:[#allocation17 + $0x64] sm:$0xf] %v826_v57  ;;  %v849_v5 = vpack.c.bf16 %v1968_v22, %v847_v63  ;;  %v872_v6 = vpack.c.bf16 %v1968_v22, %v870_v0  ;;  %v910_v8 = vunpack.c.h.bf16 %v1742_v52 }
  0x29   : > { %1841 = vmatprep.subr.bf16.mxu0 %v1925_v42  ;;  %1884 = vmatprep.subr.bf16.mxu1 %v1925_v42  ;;  %484 = vst [vmem:[#allocation17 + $0x28] sm:$0xf] %v481_v58  ;;  %507 = vst [vmem:[#allocation17 + $0x2c] sm:$0xf] %v504_v59  ;;  %v525_v7 = vsel %vm249_vm3, %v519_v60, %v2005_v2  ;;  %v548_v12 = vsel %vm249_vm3, %v542_v3, %v2005_v2  ;;  %v565_v14 = vunpack.c.l.bf16 %v1728_v61  ;;  %v1933_v35 = vld [vmem:[#allocation17 + $0x50] sm:$0xff]  }
  0x2a   : > { %v527_v10 = vpack.c.bf16 %v1968_v22, %v525_v7  ;;  %v893_v13 = vsel %vm249_vm3, %v887_v4, %v2005_v2  ;;  %852 = vst [vmem:[#allocation17 + $0x68] sm:$0xf] %v849_v5  ;;  %875 = vst [vmem:[#allocation17 + $0x6c] sm:$0xf] %v872_v6  ;;  %v550_v15 = vpack.c.bf16 %v1968_v22, %v548_v12  ;;  %v588_v18 = vunpack.c.h.bf16 %v1728_v61  ;;  %v1934_v11 = vld [vmem:[#allocation17 + $0x18] sm:$0xff]  }
  0x2b   : > { %v895_v16 = vpack.c.bf16 %v1968_v22, %v893_v13  ;;  %v916_v17 = vsel %vm249_vm3, %v910_v8, %v2005_v2  ;;  %v571_v21 = vsel %vm249_vm3, %v565_v14, %v2005_v2  ;;  %v933_v23 = vunpack.c.l.bf16 %v1744_v9  ;;  %v1935_v36 = vld [vmem:[#allocation17 + $0x58] sm:$0xff]  }
  0x2c   : > { %1842 = vmatpush3.bf16.msra.mxu0 %v1925_v42  ;;  %1892 = vmatpush3.bf16.msra.mxu1 %v1925_v42  ;;  %530 = vst [vmem:[#allocation17 + $0x30] sm:$0xf] %v527_v10  ;;  %v918_v20 = vpack.c.bf16 %v1968_v22, %v916_v17  ;;  %v956_v24 = vunpack.c.h.bf16 %v1744_v9  ;;  %553 = vst [vmem:[#allocation17 + $0x34] sm:$0xf] %v550_v15  ;;  %v573_v25 = vpack.c.bf16 %v1968_v22, %v571_v21 }
  0x2d   : > { %1843 = vmatprep.subr.bf16.mxu0 %v1926_v62  ;;  %1885 = vmatprep.subr.bf16.mxu1 %v1926_v62  ;;  %898 = vst [vmem:[#allocation17 + $0x70] sm:$0xf] %v895_v16  ;;  %v594_v26 = vsel %vm249_vm3, %v588_v18, %v2005_v2  ;;  %v939_v28 = vsel %vm249_vm3, %v933_v23, %v2005_v2  ;;  %v1936_v37 = vld [vmem:[#allocation17 + $0x20] sm:$0xff]  }
  0x2e   : > { %921 = vst [vmem:[#allocation17 + $0x74] sm:$0xf] %v918_v20  ;;  %v596_v27 = vpack.c.bf16 %v1968_v22, %v594_v26  ;;  %v962_v29 = vsel %vm249_vm3, %v956_v24, %v2005_v2  ;;  %576 = vst [vmem:[#allocation17 + $0x38] sm:$0xf] %v573_v25  ;;  %v941_v30 = vpack.c.bf16 %v1968_v22, %v939_v28 }
  0x2f   : > { %v964_v31 = vpack.c.bf16 %v1968_v22, %v962_v29  ;;  %v1937_v38 = vld [vmem:[#allocation17 + $0x60] sm:$0xff]  }
  0x30   : > { %1844 = vmatpush3.bf16.msra.mxu0 %v1926_v62  ;;  %1893 = vmatpush3.bf16.msra.mxu1 %v1926_v62  ;;  %599 = vst [vmem:[#allocation17 + $0x3c] sm:$0xf] %v596_v27  ;;  %944 = vst [vmem:[#allocation17 + $0x78] sm:$0xf] %v941_v30  ;;  %v1938_v22 = vld [vmem:[#allocation17 + $0x28] sm:$0xff]  }
  0x31   : > { %1845 = vmatprep.subr.bf16.mxu0 %v1927_v19  ;;  %1886 = vmatprep.subr.bf16.mxu1 %v1927_v19  ;;  %967 = vst [vmem:[#allocation17 + $0x7c] sm:$0xf] %v964_v31  ;;  %v1939_v39 = vld [vmem:[#allocation17 + $0x68] sm:$0xff]  }
  0x33   : > { %v1940_v40 = vld [vmem:[#allocation17 + $0x30] sm:$0xff]  }
  0x34   : > { %1846 = vmatpush3.bf16.msra.mxu0 %v1927_v19  ;;  %1894 = vmatpush3.bf16.msra.mxu1 %v1927_v19 }
  0x35   : > { %v1941_v41 = vld [vmem:[#allocation17 + $0x70] sm:$0xff]  }
  0x37   : > { %1848 = vmatmul.mubr.bf16.vlgmr.msra.gmra.mxu0 %v1930_v32  ;;  %1864 = vmatmul.mubr.bf16.vlgmr.msra.gmra.mxu1 %v1931_v33  ;;  %v1942_v42 = vld [vmem:[#allocation17 + $0x38] sm:$0xff]  }
  0x38   : > { %1851 = vmatprep.mubr.bf16.mxu0 %v1932_v34  ;;  %1867 = vmatprep.mubr.bf16.mxu1 %v1933_v35  ;;  %v1943_v43 = vld [vmem:[#allocation17 + $0x78] sm:$0xff]  }
  0x3f   : > { %1852 = vmatmul.mubr.bf16.gmra.mxu0 %v1934_v11  ;;  %1868 = vmatmul.mubr.bf16.gmra.mxu1 %v1935_v36 }
  0x40   : > { %1855 = vmatprep.mubr.bf16.mxu0 %v1936_v37  ;;  %1871 = vmatprep.mubr.bf16.mxu1 %v1937_v38 }
  0x47   : > { %1856 = vmatmul.mubr.bf16.gmra.mxu0 %v1938_v22  ;;  %1872 = vmatmul.mubr.bf16.gmra.mxu1 %v1939_v39 }
  0x48   : > { %1859 = vmatprep.mubr.bf16.mxu0 %v1940_v40  ;;  %1875 = vmatprep.mubr.bf16.mxu1 %v1941_v41 }
  0x4f   : > { %1860 = vmatmul.mubr.bf16.gmra.mxu0 %v1942_v42  ;;  %1876 = vmatmul.mubr.bf16.gmra.mxu1 %v1943_v43 }
  0xf7   : > { %v1849_v45 = vpop.f32.mrf.mxu0  ;;  %v1865_v46 = vpop.f32.mrf.mxu1 }
  0xf8   : > { %v1465_v47 = vadd.f32 %v1849_v45, %v2224_v44  ;;  %v1529_v48 = vadd.f32 %v1865_v46, %v2224_v44 }
  0xf9   : > { %v1456_v49 = vpop.f32.mrf.mxu0  ;;  %v1520_v50 = vpop.f32.mrf.mxu1 }
  0xfa   : > { %1585 = vst [vmem:[%s2229_s18 + $0x10] sm:$0xff] %v1465_v47  ;;  %1601 = vst [vmem:[%s2229_s18 + $0x90] sm:$0xff] %v1529_v48  ;;  %v1457_v51 = vadd.f32 %v2224_v44, %v1456_v49  ;;  %v1521_v52 = vadd.f32 %v2224_v44, %v1520_v50 }
  0xfb   : > { %v1850_v53 = vpop.f32.mrf.mxu0  ;;  %v1866_v54 = vpop.f32.mrf.mxu1 }
  0xfc   : > { %1583 = vst [vmem:[%s2229_s18] sm:$0xff] %v1457_v51  ;;  %1599 = vst [vmem:[%s2229_s18 + $0x80] sm:$0xff] %v1521_v52  ;;  %v1468_v55 = vadd.f32 %v1850_v53, %v2224_v44  ;;  %v1532_v56 = vadd.f32 %v1866_v54, %v2224_v44 }
  0xfd   : > { %v1459_v57 = vpop.f32.mrf.mxu0  ;;  %v1523_v58 = vpop.f32.mrf.mxu1 }
  0xfe   : > { %1586 = vst [vmem:[%s2229_s18 + $0x18] sm:$0xff] %v1468_v55  ;;  %1602 = vst [vmem:[%s2229_s18 + $0x98] sm:$0xff] %v1532_v56  ;;  %v1460_v59 = vadd.f32 %v2224_v44, %v1459_v57  ;;  %v1524_v60 = vadd.f32 %v2224_v44, %v1523_v58 }
  0xff   : > { %v1853_v61 = vpop.f32.mrf.mxu0  ;;  %v1869_v62 = vpop.f32.mrf.mxu1 }
 0x100   : > { %1584 = vst [vmem:[%s2229_s18 + $0x8] sm:$0xff] %v1460_v59  ;;  %1600 = vst [vmem:[%s2229_s18 + $0x88] sm:$0xff] %v1524_v60  ;;  %v1481_v63 = vadd.f32 %v1853_v61, %v2224_v44  ;;  %v1545_v0 = vadd.f32 %v1869_v62, %v2224_v44 }
 0x101   : > { %v1472_v3 = vpop.f32.mrf.mxu0  ;;  %v1536_v4 = vpop.f32.mrf.mxu1 }
 0x102   : > { %1589 = vst [vmem:[%s2229_s18 + $0x30] sm:$0xff] %v1481_v63  ;;  %1605 = vst [vmem:[%s2229_s18 + $0xb0] sm:$0xff] %v1545_v0  ;;  %v1473_v5 = vadd.f32 %v2224_v44, %v1472_v3  ;;  %v1537_v6 = vadd.f32 %v2224_v44, %v1536_v4 }
 0x103   : > { %v1854_v7 = vpop.f32.mrf.mxu0  ;;  %v1870_v8 = vpop.f32.mrf.mxu1 }
 0x104   : > { %1587 = vst [vmem:[%s2229_s18 + $0x20] sm:$0xff] %v1473_v5  ;;  %1603 = vst [vmem:[%s2229_s18 + $0xa0] sm:$0xff] %v1537_v6  ;;  %v1484_v9 = vadd.f32 %v1854_v7, %v2224_v44  ;;  %v1548_v10 = vadd.f32 %v1870_v8, %v2224_v44 }
 0x105   : > { %v1475_v12 = vpop.f32.mrf.mxu0  ;;  %v1539_v13 = vpop.f32.mrf.mxu1 }
 0x106   : > { %1590 = vst [vmem:[%s2229_s18 + $0x38] sm:$0xff] %v1484_v9  ;;  %1606 = vst [vmem:[%s2229_s18 + $0xb8] sm:$0xff] %v1548_v10  ;;  %v1476_v14 = vadd.f32 %v2224_v44, %v1475_v12  ;;  %v1540_v15 = vadd.f32 %v2224_v44, %v1539_v13 }
 0x107   : > { %v1857_v16 = vpop.f32.mrf.mxu0  ;;  %v1873_v17 = vpop.f32.mrf.mxu1 }
 0x108   : > { %1588 = vst [vmem:[%s2229_s18 + $0x28] sm:$0xff] %v1476_v14  ;;  %1604 = vst [vmem:[%s2229_s18 + $0xa8] sm:$0xff] %v1540_v15  ;;  %v1497_v18 = vadd.f32 %v1857_v16, %v2224_v44  ;;  %v1561_v19 = vadd.f32 %v1873_v17, %v2224_v44 }
 0x109   : > { %v1488_v20 = vpop.f32.mrf.mxu0  ;;  %v1552_v21 = vpop.f32.mrf.mxu1 }
 0x10a   : > { %1593 = vst [vmem:[%s2229_s18 + $0x50] sm:$0xff] %v1497_v18  ;;  %1609 = vst [vmem:[%s2229_s18 + $0xd0] sm:$0xff] %v1561_v19  ;;  %v1489_v23 = vadd.f32 %v2224_v44, %v1488_v20  ;;  %v1553_v24 = vadd.f32 %v2224_v44, %v1552_v21 }
 0x10b   : > { %v1858_v25 = vpop.f32.mrf.mxu0  ;;  %v1874_v26 = vpop.f32.mrf.mxu1 }
 0x10c   : > { %1591 = vst [vmem:[%s2229_s18 + $0x40] sm:$0xff] %v1489_v23  ;;  %1607 = vst [vmem:[%s2229_s18 + $0xc0] sm:$0xff] %v1553_v24  ;;  %v1500_v27 = vadd.f32 %v1858_v25, %v2224_v44  ;;  %v1564_v28 = vadd.f32 %v1874_v26, %v2224_v44 }
 0x10d   : > { %v1491_v29 = vpop.f32.mrf.mxu0  ;;  %v1555_v30 = vpop.f32.mrf.mxu1 }
 0x10e   : > { %1594 = vst [vmem:[%s2229_s18 + $0x58] sm:$0xff] %v1500_v27  ;;  %1610 = vst [vmem:[%s2229_s18 + $0xd8] sm:$0xff] %v1564_v28  ;;  %v1492_v31 = vadd.f32 %v2224_v44, %v1491_v29  ;;  %v1556_v32 = vadd.f32 %v2224_v44, %v1555_v30 }
 0x10f   : > { %v1861_v33 = vpop.f32.mrf.mxu0  ;;  %v1877_v34 = vpop.f32.mrf.mxu1 }
 0x110   : > { %1592 = vst [vmem:[%s2229_s18 + $0x48] sm:$0xff] %v1492_v31  ;;  %1608 = vst [vmem:[%s2229_s18 + $0xc8] sm:$0xff] %v1556_v32  ;;  %v1513_v35 = vadd.f32 %v1861_v33, %v2224_v44  ;;  %v1577_v11 = vadd.f32 %v1877_v34, %v2224_v44 }
 0x111   : > { %v1504_v36 = vpop.f32.mrf.mxu0  ;;  %v1568_v37 = vpop.f32.mrf.mxu1 }
 0x112   : > { %1597 = vst [vmem:[%s2229_s18 + $0x70] sm:$0xff] %v1513_v35  ;;  %1613 = vst [vmem:[%s2229_s18 + $0xf0] sm:$0xff] %v1577_v11  ;;  %v1505_v38 = vadd.f32 %v2224_v44, %v1504_v36  ;;  %v1569_v22 = vadd.f32 %v2224_v44, %v1568_v37 }
 0x113   : > { %v1862_v39 = vpop.f32.mrf.mxu0  ;;  %v1878_v40 = vpop.f32.mrf.mxu1 }
 0x114   : > { %1595 = vst [vmem:[%s2229_s18 + $0x60] sm:$0xff] %v1505_v38  ;;  %1611 = vst [vmem:[%s2229_s18 + $0xe0] sm:$0xff] %v1569_v22  ;;  %v1516_v41 = vadd.f32 %v1862_v39, %v2224_v44  ;;  %v1580_v42 = vadd.f32 %v1878_v40, %v2224_v44 }
 0x115   : > { %v1507_v43 = vpop.f32.mrf.mxu0  ;;  %v1571_v45 = vpop.f32.mrf.mxu1 }
 0x116   : > { %1598 = vst [vmem:[%s2229_s18 + $0x78] sm:$0xff] %v1516_v41  ;;  %1614 = vst [vmem:[%s2229_s18 + $0xf8] sm:$0xff] %v1580_v42  ;;  %v1508_v46 = vadd.f32 %v2224_v44, %v1507_v43  ;;  %v1572_v47 = vadd.f32 %v2224_v44, %v1571_v45 }
 0x118   : > { %1596 = vst [vmem:[%s2229_s18 + $0x68] sm:$0xff] %v1508_v46  ;;  %1612 = vst [vmem:[%s2229_s18 + $0xe8] sm:$0xff] %v1572_v47 }
 0x119 PF: > { %s26_s24 = sadd.s32 1, %s1966_s24   ;;  %s2310_s22 = smov %s1962_s23 }
 0x11a   : > { %p23_p5 = scmp.ge.s32.totalorder %s26_s24, 4   ;;  %s2311_s23 = smov %s2313_s1 }
 0x11c   :  { %25 = sbr.rel (!%p23_p5) target bundleno = 3 (0x3), region = 146 }

</bundles_post_ra>
